<compile_context>
chip_gen: v5e
topology: v5e:2x2
jax: 0.10.0
libtpu: 0.0.40
codegen_flags: <defaults>
</compile_context>

<pallas_src>
import jax
import jax.numpy as jnp
from jax import lax
from jax.experimental import pallas as pl
from jax.experimental.pallas import tpu as pltpu


def _choose_strip(block_t: int, F: int) -> int:
    """Rows per inner compute strip (~256 KiB of f32 temporaries per strip)."""
    target = (256 * 1024) // max(F * 4, 1)
    target = max(8, min(512, (target // 8) * 8))
    if block_t <= target:
        return block_t
    if block_t % 8 == 0:
        strip = target
        while block_t % strip != 0:   # terminates at 8 (block_t % 8 == 0)
            strip -= 8
        return strip
    return target                     # ragged tail strip handled statically


def _make_lambda3_kernel(T, F, rank, block_t, strip, nb, split_off, overlap, unroll):
    n_full = block_t // strip
    rem = block_t - n_full * strip

    def strip_contrib(x_ref, start, rows, prev, acc, masked, rows_valid):
        # Diff targets are block-local rows [start, start+rows); target r uses rows
        # r and r-1, with the predecessor of row `start` supplied by `prev`.
        xs = x_ref[pl.ds(start, rows), :].astype(jnp.float32)          # (rows, F)
        if rows == 1:
            lo = prev
        else:
            lo = jnp.concatenate([prev, xs[: rows - 1, :]], axis=0)    # strip-sized copy only
        d = xs - lo
        if masked:
            # Only emitted on the (single) tail/overrun block: mask diffs whose global
            # row index is >= T.  Select on d (before the square) so DMA-padding
            # garbage (Inf/NaN) cannot propagate.
            ridx = lax.broadcasted_iota(jnp.int32, (rows, 1), 0)
            d = jnp.where(start + ridx < rows_valid, d, 0.0)
        s = d * d
        sh = s[:, :rank] + s[:, rank:]                                 # re^2 + im^2 (half width)
        cube = sh * jnp.sqrt(sh)                                       # |z|^3, NaN-safe at 0
        acc = acc + jnp.sum(cube, axis=0, keepdims=True)               # (1, rank)
        return xs[rows - 1 : rows, :], acc

    def kernel(x_ref, out_ref, carry_ref):
        c = pl.program_id(0)                    # split (TensorCore) index
        j = pl.program_id(1)                    # block index within the split
        gb = c * split_off + j                  # global block index (matches index_map)

        @pl.when(j == 0)
        def _():
            out_ref[...] = jnp.zeros_like(out_ref)
            # Row 0 of this split has no in-kernel predecessor -> its diff becomes 0
            # (row 0 of the whole tensor has none; the split seam is re-added outside).
            carry_ref[...] = x_ref[0:1, :].astype(jnp.float32)

        def run(masked):
            rows_valid = T - gb * block_t       # only used on the masked path

            def body(s_i, carry):
                prev, acc = carry
                start = s_i * strip
                if strip % 8 == 0:
                    start = pl.multiple_of(start, 8)
                return strip_contrib(x_ref, start, strip, prev, acc, masked, rows_valid)

            prev = carry_ref[...]
            acc = jnp.zeros((1, rank), jnp.float32)
            if n_full > 0:
                prev, acc = lax.fori_loop(0, n_full, body, (prev, acc), unroll=unroll)
            if rem > 0:
                prev, acc = strip_contrib(x_ref, n_full * strip, rem, prev, acc,
                                          masked, rows_valid)
            out_ref[0:1, :] = out_ref[0:1, :] + acc

        is_full = gb < (nb - 1)                 # every block but the tail is full
        if overlap:
            # nb odd: split 1's first grid step re-reads split 0's last block just to
            # load the carry (no contribution), so the seam diff is computed in-kernel.
            active = jnp.logical_or(c == 0, j > 0)
            cond_fast = jnp.logical_and(is_full, active)
            cond_masked = jnp.logical_and(jnp.logical_not(is_full), active)
        else:
            cond_fast = is_full
            cond_masked = jnp.logical_not(is_full)

        @pl.when(cond_fast)                     # steady state: no mask work at all
        def _():
            run(masked=False)

        @pl.when(cond_masked)                   # tail block only
        def _():
            run(masked=True)

        # Carry this block's last row for the next block's boundary diff.
        carry_ref[...] = x_ref[block_t - 1 : block_t, :].astype(jnp.float32)

    return kernel


def lambda3_pallas(factor: jax.Array, weight: float, block_t: int | None = None) -> jax.Array:
    """Pallas implementation of Lambda3.forward(factor)."""
    T, F = factor.shape
    assert F % 2 == 0, "feature dim must be 2*rank"
    assert T >= 2, "need at least two timestamps"
    rank = F // 2
    itemsize = jnp.dtype(factor.dtype).itemsize

    # --- tile sizing: ~4 MiB DMA blocks built from ~256 KiB compute strips ----------
    strip_target = (256 * 1024) // max(F * 4, 1)
    strip_target = max(8, min(512, (strip_target // 8) * 8))
    if block_t is None:
        n_strips = max(1, min(16, (4 * 1024 * 1024) // max(strip_target * F * itemsize, 1)))
        block_t = strip_target * n_strips
    block_t = min(block_t, T)
    if block_t < T:
        block_t = max(8, (block_t // 8) * 8)    # multi-block: keep (8,128) alignment
        if block_t >= T:
            block_t = T
    strip = _choose_strip(block_t, F)
    n_full = block_t // strip
    if n_full <= 8:
        unroll = True
    else:
        unroll = next(u for u in (8, 4, 2, 1) if n_full % u == 0)

    nb = -(-T // block_t)                       # number of row blocks
    num_splits = 2 if nb >= 2 else 1            # 2-way row split (2 TCs on v7x)
    P = -(-nb // num_splits)                    # blocks per split (grid extent)
    split_off = nb - P                          # first block index of split 1
    overlap = (num_splits == 2) and (split_off < P)   # nb odd -> one re-read block

    kernel = _make_lambda3_kernel(T, F, rank, block_t, strip, nb, split_off, overlap, unroll)

    # Explicit VMEM budget: 2x double-buffered input block + strip-sized f32
    # temporaries (with margin) + small out/carry buffers + slack.
    block_bytes = block_t * F * itemsize
    strip_f32_bytes = strip * F * 4
    vmem_limit = int(min(48 * 1024 * 1024,
                         max(24 * 1024 * 1024,
                             2 * block_bytes + 12 * strip_f32_bytes + (2 << 20))))

    out = pl.pallas_call(
        kernel,
        out_shape=jax.ShapeDtypeStruct((num_splits * 8, rank), jnp.float32),
        grid_spec=pltpu.PrefetchScalarGridSpec(
            num_scalar_prefetch=0,
            grid=(num_splits, P),
            in_specs=[pl.BlockSpec((block_t, F), lambda c, j: (c * split_off + j, 0))],
            out_specs=pl.BlockSpec((8, rank), lambda c, j: (c, 0)),
            scratch_shapes=[pltpu.VMEM((1, F), jnp.float32)],   # carried last row
        ),
        compiler_params=pltpu.CompilerParams(
            dimension_semantics=("parallel", "arbitrary"),
            vmem_limit_bytes=vmem_limit,
        ),
    )(factor)

    total = jnp.sum(out)
    if num_splits == 2 and not overlap:
        # Even block count: the diff across the split seam was zeroed in-kernel
        # (carry init of split 1); add it back here (one row of work).
        seam = split_off * block_t
        d = (factor[seam] - factor[seam - 1]).astype(jnp.float32)
        sh = d[:rank] ** 2 + d[rank:] ** 2
        total = total + jnp.sum(sh * jnp.sqrt(sh))
    return (weight * total / (T - 1)).astype(jnp.float32)


def lambda3_ref(factor: jax.Array, weight: float) -> jax.Array:
    """Pure-JAX reference (mirrors the PyTorch forward)."""
    ddiff = factor[1:] - factor[:-1]
    rank = ddiff.shape[1] // 2
    diff = jnp.sqrt(ddiff[:, :rank] ** 2 + ddiff[:, rank:] ** 2) ** 3
    return (weight * jnp.sum(diff) / (factor.shape[0] - 1)).astype(jnp.float32)


def _check(out, ref, tag):
    assert jnp.allclose(out, ref, rtol=5e-4, atol=1e-3), (tag, out, ref)


if __name__ == "__main__":
    key = jax.random.PRNGKey(0)
    weight = 0.1

    # 1) Small single-block case (block_t == T), lane-aligned rank.
    T1, rank1 = 17, 64
    f1 = jax.random.normal(jax.random.fold_in(key, 0), (T1, 2 * rank1), dtype=jnp.float32)
    out1 = jax.block_until_ready(lambda3_pallas(f1, weight))
    _check(out1, lambda3_ref(f1, weight), "single-block")

    # 2) Multi-block, even block count: 2-way split + wrapper seam + masked tail block.
    T2, rank2 = 203, 64
    f2 = jax.random.normal(jax.random.fold_in(key, 1), (T2, 2 * rank2), dtype=jnp.float32)
    out2 = jax.block_until_ready(lambda3_pallas(f2, weight, block_t=64))
    _check(out2, lambda3_ref(f2, weight), "even-split")

    # 3) Non-lane-aligned rank + odd block count (overlapped-carry split path).
    T3, rank3 = 33, 50
    f3 = jax.random.normal(jax.random.fold_in(key, 2), (T3, 2 * rank3), dtype=jnp.float32)
    out3 = jax.block_until_ready(lambda3_pallas(f3, weight, block_t=16))
    _check(out3, lambda3_ref(f3, weight), "odd-split-unaligned-rank")

    # 4) Multi-strip inner fori_loop inside a block + masked tail + split seam.
    T4, rank4 = 1200, 64
    f4 = jax.random.normal(jax.random.fold_in(key, 3), (T4, 2 * rank4), dtype=jnp.float32)
    out4 = jax.block_until_ready(lambda3_pallas(f4, weight, block_t=768))
    _check(out4, lambda3_ref(f4, weight), "multi-strip")

    # 5) Auto block sizing on the same data (single block with full strips + ragged tail strip).
    out5 = jax.block_until_ready(lambda3_pallas(f4, weight))
    _check(out5, lambda3_ref(f4, weight), "auto-block")

    print("KERNEL_OK")
</pallas_src>

<mosaic_0001>
module attributes {stable_mosaic.version = 11 : i64} {
  func.func @kernel(%arg0: i32, %arg1: i32, %arg2: memref<17x128xf32, #tpu.memory_space<vmem>>, %arg3: memref<8x64xf32, #tpu.memory_space<vmem>>, %arg4: memref<1x128xf32, #tpu.memory_space<vmem>>) attributes {dimension_semantics = [#tpu.dimension_semantics<parallel>, #tpu.dimension_semantics<arbitrary>], iteration_bounds = array<i64: 1, 1>, scalar_prefetch = 0 : i64, scratch_operands = 1 : i64, tpu.core_type = #tpu.core_type<tc>, window_params = [{transform_indices = @transform_0, window_bounds = array<i64: 17, 128>}, {transform_indices = @transform_1, window_bounds = array<i64: 8, 64>}]} {
    %c0_i32 = arith.constant 0 : i32
    %0 = arith.muli %arg0, %c0_i32 : i32
    %1 = arith.addi %0, %arg1 : i32
    %c0_i32_0 = arith.constant 0 : i32
    %2 = arith.cmpi eq, %arg1, %c0_i32_0 : i32
    %3 = arith.extui %2 : i1 to i32
    %c0_i32_1 = arith.constant 0 : i32
    %4 = arith.cmpi ne, %3, %c0_i32_1 : i32
    scf.if %4 {
      %cst = arith.constant 0.000000e+00 : f32
      %13 = vector.broadcast %cst : f32 to vector<8x64xf32>
      %c0_7 = arith.constant 0 : index
      %c0_8 = arith.constant 0 : index
      %14 = vector.load %arg3[%c0_7, %c0_8] : memref<8x64xf32, #tpu.memory_space<vmem>>, vector<8x64xf32>
      tpu.vector_store %arg3[%c0_7, %c0_8], %13 {strides = array<i32>} : memref<8x64xf32, #tpu.memory_space<vmem>>, vector<8x64xf32>,
      %c0_9 = arith.constant 0 : index
      %c0_10 = arith.constant 0 : index
      %15 = vector.load %arg2[%c0_9, %c0_10] : memref<17x128xf32, #tpu.memory_space<vmem>>, vector<1x128xf32>
      %c0_11 = arith.constant 0 : index
      %c0_12 = arith.constant 0 : index
      %16 = vector.load %arg4[%c0_11, %c0_12] : memref<1x128xf32, #tpu.memory_space<vmem>>, vector<1x128xf32>
      tpu.vector_store %arg4[%c0_11, %c0_12], %15 {strides = array<i32>} : memref<1x128xf32, #tpu.memory_space<vmem>>, vector<1x128xf32>,
    } else {
    }
    %c0_i32_2 = arith.constant 0 : i32
    %5 = arith.cmpi slt, %1, %c0_i32_2 : i32
    %true = arith.constant true
    %6 = arith.xori %5, %true : i1
    %7 = arith.extui %5 : i1 to i32
    %c0_i32_3 = arith.constant 0 : i32
    %8 = arith.cmpi ne, %7, %c0_i32_3 : i32
    scf.if %8 {
      %c0_7 = arith.constant 0 : index
      %c0_8 = arith.constant 0 : index
      %13 = vector.load %arg4[%c0_7, %c0_8] : memref<1x128xf32, #tpu.memory_space<vmem>>, vector<1x128xf32>
      %cst = arith.constant 0.000000e+00 : f32
      %14 = vector.broadcast %cst : f32 to vector<1x64xf32>
      %c0_i32_9 = arith.constant 0 : i32
      %c17_i32 = arith.constant 17 : i32
      %15 = arith.muli %c0_i32_9, %c17_i32 : i32
      %16 = arith.index_cast %15 : i32 to index
      %c0_10 = arith.constant 0 : index
      %17 = vector.load %arg2[%16, %c0_10] : memref<17x128xf32, #tpu.memory_space<vmem>>, vector<17x128xf32>
      %18 = vector.extract_strided_slice %17 {offsets = [0, 0], sizes = [16, 128], strides = [1, 1]} : vector<17x128xf32> to vector<16x128xf32>
      %19 = tpu.concatenate %13, %18 in 0 : vector<1x128xf32>, vector<16x128xf32> -> vector<17x128xf32>
      %20 = arith.subf %17, %19 : vector<17x128xf32>
      %21 = arith.mulf %20, %20 : vector<17x128xf32>
      %22 = vector.extract_strided_slice %21 {offsets = [0, 0], sizes = [17, 64], strides = [1, 1]} : vector<17x128xf32> to vector<17x64xf32>
      %23 = vector.extract_strided_slice %21 {offsets = [0, 64], sizes = [17, 64], strides = [1, 1]} : vector<17x128xf32> to vector<17x64xf32>
      %24 = arith.addf %22, %23 : vector<17x64xf32>
      %25 = math.sqrt %24 : vector<17x64xf32>
      %26 = arith.mulf %24, %25 : vector<17x64xf32>
      %cst_11 = arith.constant dense<0.000000e+00> : vector<64xf32>
      %27 = vector.multi_reduction <add>, %26, %cst_11 [0] : vector<17x64xf32> to vector<64xf32>
      %28 = vector.shape_cast %27 : vector<64xf32> to vector<1x64xf32>
      %29 = arith.addf %14, %28 : vector<1x64xf32>
      %30 = vector.extract_strided_slice %17 {offsets = [16, 0], sizes = [1, 128], strides = [1, 1]} : vector<17x128xf32> to vector<1x128xf32>
      %c1_i32 = arith.constant 1 : i32
      %c0_12 = arith.constant 0 : index
      %c0_13 = arith.constant 0 : index
      %31 = vector.load %arg3[%c0_12, %c0_13] : memref<8x64xf32, #tpu.memory_space<vmem>>, vector<1x64xf32>
      %32 = arith.addf %31, %29 : vector<1x64xf32>
      %c0_14 = arith.constant 0 : index
      %c0_15 = arith.constant 0 : index
      %33 = vector.load %arg3[%c0_14, %c0_15] : memref<8x64xf32, #tpu.memory_space<vmem>>, vector<1x64xf32>
      tpu.vector_store %arg3[%c0_14, %c0_15], %32 {strides = array<i32>} : memref<8x64xf32, #tpu.memory_space<vmem>>, vector<1x64xf32>,
    } else {
    }
    %9 = arith.extui %6 : i1 to i32
    %c0_i32_4 = arith.constant 0 : i32
    %10 = arith.cmpi ne, %9, %c0_i32_4 : i32
    scf.if %10 {
      %c17_i32 = arith.constant 17 : i32
      %13 = arith.muli %1, %c17_i32 : i32
      %c17_i32_7 = arith.constant 17 : i32
      %14 = arith.subi %c17_i32_7, %13 : i32
      %c0_8 = arith.constant 0 : index
      %c0_9 = arith.constant 0 : index
      %15 = vector.load %arg4[%c0_8, %c0_9] : memref<1x128xf32, #tpu.memory_space<vmem>>, vector<1x128xf32>
      %cst = arith.constant 0.000000e+00 : f32
      %16 = vector.broadcast %cst : f32 to vector<1x64xf32>
      %c0_i32_10 = arith.constant 0 : i32
      %c17_i32_11 = arith.constant 17 : i32
      %17 = arith.muli %c0_i32_10, %c17_i32_11 : i32
      %18 = arith.index_cast %17 : i32 to index
      %c0_12 = arith.constant 0 : index
      %19 = vector.load %arg2[%18, %c0_12] : memref<17x128xf32, #tpu.memory_space<vmem>>, vector<17x128xf32>
      %20 = vector.extract_strided_slice %19 {offsets = [0, 0], sizes = [16, 128], strides = [1, 1]} : vector<17x128xf32> to vector<16x128xf32>
      %21 = tpu.concatenate %15, %20 in 0 : vector<1x128xf32>, vector<16x128xf32> -> vector<17x128xf32>
      %22 = arith.subf %19, %21 : vector<17x128xf32>
      %23 = tpu.iota {dimensions = array<i32: 0>} : vector<17x1xi32>
      %24 = vector.broadcast %17 : i32 to vector<17x1xi32>
      %25 = arith.addi %24, %23 : vector<17x1xi32>
      %26 = vector.broadcast %14 : i32 to vector<17x1xi32>
      %27 = arith.cmpi slt, %25, %26 : vector<17x1xi32>
      %cst_13 = arith.constant 0.000000e+00 : f32
      %28 = vector.shape_cast %27 : vector<17x1xi1> to vector<17x1xi1>
      %29 = vector.broadcast %28 : vector<17x1xi1> to vector<17x128xi1>
      %30 = vector.broadcast %cst_13 : f32 to vector<17x128xf32>
      %31 = arith.select %29, %22, %30 : vector<17x128xi1>, vector<17x128xf32>
      %32 = arith.mulf %31, %31 : vector<17x128xf32>
      %33 = vector.extract_strided_slice %32 {offsets = [0, 0], sizes = [17, 64], strides = [1, 1]} : vector<17x128xf32> to vector<17x64xf32>
      %34 = vector.extract_strided_slice %32 {offsets = [0, 64], sizes = [17, 64], strides = [1, 1]} : vector<17x128xf32> to vector<17x64xf32>
      %35 = arith.addf %33, %34 : vector<17x64xf32>
      %36 = math.sqrt %35 : vector<17x64xf32>
      %37 = arith.mulf %35, %36 : vector<17x64xf32>
      %cst_14 = arith.constant dense<0.000000e+00> : vector<64xf32>
      %38 = vector.multi_reduction <add>, %37, %cst_14 [0] : vector<17x64xf32> to vector<64xf32>
      %39 = vector.shape_cast %38 : vector<64xf32> to vector<1x64xf32>
      %40 = arith.addf %16, %39 : vector<1x64xf32>
      %41 = vector.extract_strided_slice %19 {offsets = [16, 0], sizes = [1, 128], strides = [1, 1]} : vector<17x128xf32> to vector<1x128xf32>
      %c1_i32 = arith.constant 1 : i32
      %c0_15 = arith.constant 0 : index
      %c0_16 = arith.constant 0 : index
      %42 = vector.load %arg3[%c0_15, %c0_16] : memref<8x64xf32, #tpu.memory_space<vmem>>, vector<1x64xf32>
      %43 = arith.addf %42, %40 : vector<1x64xf32>
      %c0_17 = arith.constant 0 : index
      %c0_18 = arith.constant 0 : index
      %44 = vector.load %arg3[%c0_17, %c0_18] : memref<8x64xf32, #tpu.memory_space<vmem>>, vector<1x64xf32>
      tpu.vector_store %arg3[%c0_17, %c0_18], %43 {strides = array<i32>} : memref<8x64xf32, #tpu.memory_space<vmem>>, vector<1x64xf32>,
    } else {
    }
    %c16 = arith.constant 16 : index
    %c0 = arith.constant 0 : index
    %11 = vector.load %arg2[%c16, %c0] : memref<17x128xf32, #tpu.memory_space<vmem>>, vector<1x128xf32>
    %c0_5 = arith.constant 0 : index
    %c0_6 = arith.constant 0 : index
    %12 = vector.load %arg4[%c0_5, %c0_6] : memref<1x128xf32, #tpu.memory_space<vmem>>, vector<1x128xf32>
    tpu.vector_store %arg4[%c0_5, %c0_6], %11 {strides = array<i32>} : memref<1x128xf32, #tpu.memory_space<vmem>>, vector<1x128xf32>,
    return
  }
  func.func @transform_0(%arg0: i32, %arg1: i32) -> (i32, i32) {
    %c0_i32 = arith.constant 0 : i32
    %0 = arith.muli %arg0, %c0_i32 : i32
    %1 = arith.addi %0, %arg1 : i32
    %c0_i32_0 = arith.constant 0 : i32
    %c0_i32_1 = arith.constant 0 : i32
    return %1, %c0_i32_0 : i32, i32
  }
  func.func @transform_1(%arg0: i32, %arg1: i32) -> (i32, i32) {
    %c0_i32 = arith.constant 0 : i32
    %c0_i32_0 = arith.constant 0 : i32
    return %arg0, %c0_i32 : i32, i32
  }
}

</mosaic_0001>

<bundles_post_ra>
// kernel: tpu_custom_call.1
= control target key start
LH: loop header
LB: loop body
LE: loop exit
PB: predicated region body
PF: predicated region fallthrough
CT: control target
= control target key end

     0   :  { %6 = vsyncpa [#allocation4], 0  ;;  %s352_s0 = inlined_call_operand.hbm [shape: f32[17,128], index: 0, kind: input, shape index: {}]   ;;  %s353_s1 = inlined_call_operand.hbm [shape: f32[8,64], index: 1, kind: output, shape index: {}]  }
   0x1   :  { %7 = vsyncpa [#allocation5], 0  ;;  %s12_s8 = sshll.u32 %s352_s0, 4  ;;  %s325_s9 = smov [#allocation3]   ;;  %s13_s8 = int_to_ptr.hbm [resolvable:$true] %s12_s8 }
   0x2   :  { %s14_s10 = sshll.u32 %s325_s9, 4  ;;  %s326_s11 = smov 128   ;;  %s15_s10 = int_to_ptr.vmem [resolvable:$true] %s14_s10 }
   0x3   :  { %s327_s12 = smov 8  }
   0x4   :  { %20 = dma.hbm_to_vmem [thread:$0]  %s13_s8, 384, %s15_s10, [#allocation4], %s326_s11, %s326_s11, %s327_s12  }
   0x5   :  { %321 = dma.done.wait [#allocation4], 384  }
   0x6   :  { %322 = vsyncadd [#allocation4], 4294966912  ;;  %v151_v0 = vlaneseq  ;;  %v136_v3 = vld [vmem:[#allocation3 + $0x8] sm:$0xff]  ;;  %v137_v4 = vld [vmem:[#allocation3 + $0x10] sm:$0x1]  ;;  %vm140_vm1 = vcmask 1040384  }
   0x7   :  { %v31_v5 = vld [vmem:[#allocation3] sm:$0x1]  ;;  %v142_v6 = vrot.slane %v136_v3, 7  ;;  %v242_v12 = vld [vmem:[#allocation3 + $0x10] sm:$0x1]  ;;  %s328_s0 = smov 64  }
   0x8   :  { %v152_v1 = vshrl.u32 %v151_v0, 7  ;;  %32 = vst [vmem:[#allocation2] sm:$0x1] %v31_v5  ;;  %v135_v7 = vld [vmem:[#allocation3] sm:$0xff]  ;;  %vm29_vm2 = vcmask 523264   ;;  %v329_v20 = vmov 0.0  }
   0x9   :  { %v150_v8 = vsub.f32 %v137_v4, %v142_v6  ;;  %v141_v10 = vrot.slane %v135_v7, 7  ;;  %30 = vst.msk [vmem:[#allocation6] sm:$0xff] %vm29_vm2, %v329_v20  ;;  %vm229_vm9 = vcmask 516096   ;;  %s330_s13 = smov [#allocation6]   ;;  %s251_s17 = sshll.u32 %s353_s1, 4  ;;  %s252_s17 = int_to_ptr.hbm [resolvable:$true] %s251_s17 }
   0xa   :  { %v154_v2 = vadd.s32 16, %v152_v1  ;;  %s249_s14 = sshll.u32 %s330_s13, 4  ;;  %s250_s14 = int_to_ptr.vmem [resolvable:$true] %s249_s14 }
   0xb   :  { %v143_v16 = vsel %vm140_vm1, %v141_v10, %v142_v6 }
   0xc   :  { %vm158_vm0 = vcmp.lt.s32.totalorder %v154_v2, 17  ;;  %v149_v18 = vsub.f32 %v136_v3, %v143_v16 }
   0xd   :  { %v167_v9 = vsel %vm158_vm0, %v150_v8, 0.0 }
   0xe   :  { %v170_v11 = vmul.f32 %v167_v9, %v167_v9  ;;  %v169_v19 = vmul.f32 %v149_v18, %v149_v18 }
   0xf   :  { %v134_v13 = vld [vmem:[#allocation2] sm:$0x1] }
  0x10   :  { %178 = vrot.lane.b32.xlu1 %v170_v11, %s328_s0  ;;  %v147_v14 = vsel %vm140_vm1, %v134_v13, %v141_v10  ;;  %243 = vst [vmem:[#allocation2] sm:$0x1] %v242_v12  ;;  %v239_v6 = vld [vmem:[#allocation6] sm:$0x1] }
  0x11   :  { %v148_v15 = vsub.f32 %v135_v7, %v147_v14 }
  0x13   :  { %v168_v17 = vmul.f32 %v148_v15, %v148_v15 }
  0x15   :  { %174 = vrot.lane.b32.xlu0 %v168_v17, %s328_s0 }
  0x1d   :  { %176 = vrot.lane.b32.xlu0 %v169_v19, %s328_s0 }
  0x82   :  { %v179_v21 = vpop.permute.xlu1 %178 }
  0x83   :  { %v185_v22 = vadd.f32 %v179_v21, %v170_v11 }
  0x85   :  { %267 = vrsqrt.f32 %v185_v22  ;;  %vm217_vm4 = vcmp.eq.f32.partialorder %v185_v22, inf  ;;  %v220_v51 = vand.u32 2147483648, %v185_v22  ;;  %vm219_vm6 = vcmp.eq.f32.partialorder %v185_v22, 0.0 }
  0x87   :  { %v175_v23 = vpop.permute.xlu0 %174 }
  0x88   :  { %v183_v24 = vadd.f32 %v175_v23, %v168_v17 }
  0x8a   :  { %269 = vrsqrt.f32 %v183_v24  ;;  %vm193_vm3 = vcmp.eq.f32.partialorder %v183_v24, inf  ;;  %v196_v47 = vand.u32 2147483648, %v183_v24  ;;  %vm195_vm5 = vcmp.eq.f32.partialorder %v183_v24, 0.0 }
  0x8b   :  { %v268_v25 = vpop.eup %267 }
  0x8c   :  { %v211_v26 = vmul.f32 %v268_v25, %v185_v22 }
  0x8e   :  { %v212_v27 = vmul.f32 %v268_v25, %v211_v26 }
  0x8f   :  { %v177_v28 = vpop.permute.xlu0 %176 }
  0x90   :  { %v270_v29 = vpop.eup %269  ;;  %v184_v30 = vadd.f32 %v177_v28, %v169_v19  ;;  %v213_v32 = vmul.f32 0.5, %v212_v27 }
  0x91   :  { %v187_v31 = vmul.f32 %v270_v29, %v183_v24 }
  0x92   :  { %271 = vrsqrt.f32 %v184_v30  ;;  %v214_v35 = vsub.f32 1.5, %v213_v32  ;;  %vm205_vm7 = vcmp.eq.f32.partialorder %v184_v30, inf  ;;  %v208_v53 = vand.u32 2147483648, %v184_v30 }
  0x93   :  { %v188_v33 = vmul.f32 %v270_v29, %v187_v31  ;;  %vm207_vm8 = vcmp.eq.f32.partialorder %v184_v30, 0.0 }
  0x94   :  { %v215_v40 = vmul.f32 %v268_v25, %v214_v35 }
  0x95   :  { %v189_v34 = vmul.f32 0.5, %v188_v33 }
  0x96   :  { %v216_v44 = vmul.f32 %v215_v40, %v185_v22 }
  0x97   :  { %v190_v36 = vsub.f32 1.5, %v189_v34 }
  0x98   :  { %v272_v37 = vpop.eup %271  ;;  %v218_v49 = vsel %vm217_vm4, %v185_v22, %v216_v44 }
  0x99   :  { %v191_v38 = vmul.f32 %v270_v29, %v190_v36  ;;  %v199_v39 = vmul.f32 %v272_v37, %v184_v30  ;;  %v221_v54 = vsel %vm219_vm6, %v220_v51, %v218_v49 }
  0x9a   :  { %v224_v59 = vmul.f32 %v221_v54, %v185_v22 }
  0x9b   :  { %v192_v41 = vmul.f32 %v191_v38, %v183_v24  ;;  %v200_v42 = vmul.f32 %v272_v37, %v199_v39 }
  0x9c   :  { %v230_v63 = vsel %vm229_vm9, %v224_v59, 0.0 }
  0x9d   :  { %v201_v43 = vmul.f32 0.5, %v200_v42  ;;  %v194_v45 = vsel %vm193_vm3, %v183_v24, %v192_v41 }
  0x9e   :  { %v197_v50 = vsel %vm195_vm5, %v196_v47, %v194_v45 }
  0x9f   :  { %v202_v46 = vsub.f32 1.5, %v201_v43  ;;  %v222_v56 = vmul.f32 %v197_v50, %v183_v24 }
  0xa1   :  { %v203_v48 = vmul.f32 %v272_v37, %v202_v46  ;;  %v226_v60 = vsel %vm29_vm2, %v222_v56, 0.0 }
  0xa3   :  { %v204_v52 = vmul.f32 %v203_v48, %v184_v30 }
  0xa5   :  { %v206_v55 = vsel %vm205_vm7, %v184_v30, %v204_v52 }
  0xa6   :  { %v209_v57 = vsel %vm207_vm8, %v208_v53, %v206_v55 }
  0xa7   :  { %v223_v58 = vmul.f32 %v209_v57, %v184_v30 }
  0xa9   :  { %v227_v61 = vsel %vm29_vm2, %v223_v58, 0.0 }
  0xaa   :  { %v228_v62 = vadd.f32 %v227_v61, %v226_v60 }
  0xac   :  { %v231_v0 = vadd.f32 %v230_v63, %v228_v62 }
  0xae   :  { %v232_v1 = vrot.slane %v231_v0, 4 }
  0xb0   :  { %v233_v2 = vadd.f32 %v232_v1, %v231_v0 }
  0xb2   :  { %v234_v3 = vrot.slane %v233_v2, 2 }
  0xb4   :  { %v235_v4 = vadd.f32 %v234_v3, %v233_v2 }
  0xb6   :  { %v236_v5 = vrot.slane %v235_v4, 1 }
  0xb8   :  { %v237_v7 = vadd.f32 %v236_v5, %v235_v4 }
  0xba   :  { %v240_v8 = vadd.f32 %v239_v6, %v237_v7 }
  0xbc   :  { %241 = vst.msk [vmem:[#allocation6] sm:$0x1] %vm229_vm9, %v240_v8 }
  0xbd   :  { %254 = dma.vmem_to_hbm [thread:$0]  %s250_s14, 128, %s252_s17, [#allocation5]  }
  0xbe   :  { %323 = dma.done.wait [#allocation5], 128  }
  0xbf   :  { %324 = vsyncadd [#allocation5], 4294967168 }
  0xc0   :  { %259 = vsyncpa [#allocation4], 1 }
  0xc1   :  { %260 = vsyncpa [#allocation5], 1 }

</bundles_post_ra>
